<compile_context>
chip_gen: v6e
topology: v6e:2x2x1
jax: 0.10.0
libtpu: 0.0.40
codegen_flags: <defaults>
</compile_context>

<pallas_src>
import jax
import jax.numpy as jnp
from jax.experimental import pallas as pl
from jax.experimental.pallas import tpu as pltpu

EPS = 1e-5
NUM_SPLITS = 2  # stats-pass core split for v7x's 2 TensorCores (harmless on v5e/v6e)


def _stats_kernel(patches_ref, w_ref, sum_ref, sq_ref):
    """Pass 1: per-core partial per-channel sum / sum-of-squares of the conv output."""
    i = pl.program_id(1)

    @pl.when(i == 0)
    def _():
        sum_ref[...] = jnp.zeros_like(sum_ref)
        sq_ref[...] = jnp.zeros_like(sq_ref)

    # Conv tile as MXU matmul: bf16 inputs, f32 accumulation.
    y = jnp.dot(patches_ref[...], w_ref[...], preferred_element_type=jnp.float32)

    # Padded rows are exactly zero (no bias) -> contribute nothing to the moments.
    sum_ref[...] += jnp.sum(y, axis=0, keepdims=True)[None]
    sq_ref[...] += jnp.sum(y * y, axis=0, keepdims=True)[None]


def _apply_kernel(patches_ref, w_ref, scale_ref, shift_ref, o_ref):
    """Pass 2: recompute the tile matmul, apply folded BN affine + ReLU."""
    y = jnp.dot(patches_ref[...], w_ref[...], preferred_element_type=jnp.float32)
    o_ref[...] = jnp.maximum(y * scale_ref[...] + shift_ref[...], 0.0).astype(o_ref.dtype)


def inconv_forward(x, weight, bias, gamma, beta, *, tile_m=1024):
    """x: (N, Cin, H, W) f32; weight: (Cout, Cin, 3, 3); bias/gamma/beta: (Cout,)."""
    del bias  # constant conv bias is exactly cancelled by BN's batch-mean subtraction
    N, Cin, H, W = x.shape
    Cout = weight.shape[0]
    K = Cin * 9
    M = N * H * W

    # Tile rows: big tiles for pipeline efficiency, clamped so tiny inputs don't over-pad.
    tile_m = max(256, min(tile_m, pl.cdiv(M, 256) * 256))
    m_chunk = NUM_SPLITS * tile_m                      # stats grid splits evenly per core
    M_pad = pl.cdiv(M, m_chunk) * m_chunk
    grid_m = M_pad // tile_m
    grid_half = grid_m // NUM_SPLITS

    # --- glue: im2col (stride=1, pad=1) in bf16, K left unpadded ---
    # TODO(synk): do the 3x3 conv in-kernel from an NHWC bf16 tile via 9 shifted matmuls
    # to remove the ~9x im2col read inflation and the extra im2col write pass.
    xb = x.astype(jnp.bfloat16)
    xp = jnp.pad(xb, ((0, 0), (0, 0), (1, 1), (1, 1)))
    taps = [xp[:, :, kh:kh + H, kw:kw + W] for kh in range(3) for kw in range(3)]
    # (N, Cin, 9, H, W) -> (N, H, W, Cin, 9) -> (M, K), pad rows only
    patches = jnp.stack(taps, axis=2).transpose(0, 3, 4, 1, 2).reshape(M, K)
    patches = jnp.pad(patches, ((0, M_pad - M), (0, 0)))

    w_mat = weight.reshape(Cout, K).T.astype(jnp.bfloat16)        # (K, Cout), unpadded

    pm1 = pl.Buffered(3) if grid_half >= 3 else None
    pm2 = pl.Buffered(3) if grid_m >= 3 else None

    # --- pass 1: global BN statistics, split across cores on the leading axis ---
    patches_spec1 = pl.BlockSpec((tile_m, K), lambda c, i: (c * grid_half + i, 0),
                                 pipeline_mode=pm1)
    w_spec1 = pl.BlockSpec((K, Cout), lambda c, i: (0, 0))
    stat_spec = pl.BlockSpec((1, 1, Cout), lambda c, i: (c, 0, 0))

    psum, psq = pl.pallas_call(
        _stats_kernel,
        grid=(NUM_SPLITS, grid_half),
        in_specs=[patches_spec1, w_spec1],
        out_specs=[stat_spec, stat_spec],
        out_shape=[jax.ShapeDtypeStruct((NUM_SPLITS, 1, Cout), jnp.float32)] * 2,
        compiler_params=pltpu.CompilerParams(
            dimension_semantics=("parallel", "arbitrary")),
    )(patches, w_mat)

    # Tiny (Cout,)-sized combine + BatchNorm fold (biased batch variance, eps=1e-5).
    inv_m = 1.0 / float(M)
    mean = psum.sum(axis=0) * inv_m                                   # (1, Cout)
    var = jnp.maximum(psq.sum(axis=0) * inv_m - mean * mean, 0.0)     # (1, Cout)
    rstd = jax.lax.rsqrt(var + EPS)
    scale = gamma.astype(jnp.float32).reshape(1, Cout) * rstd
    shift = beta.astype(jnp.float32).reshape(1, Cout) - mean * scale

    # --- pass 2: normalize + ReLU (embarrassingly parallel over M tiles) ---
    patches_spec2 = pl.BlockSpec((tile_m, K), lambda i: (i, 0), pipeline_mode=pm2)
    w_spec2 = pl.BlockSpec((K, Cout), lambda i: (0, 0))
    vec_spec = pl.BlockSpec((1, Cout), lambda i: (0, 0))

    out2d = pl.pallas_call(
        _apply_kernel,
        grid=(grid_m,),
        in_specs=[patches_spec2, w_spec2, vec_spec, vec_spec],
        out_specs=pl.BlockSpec((tile_m, Cout), lambda i: (i, 0)),
        out_shape=jax.ShapeDtypeStruct((M_pad, Cout), jnp.float32),
        compiler_params=pltpu.CompilerParams(dimension_semantics=("parallel",)),
    )(patches, w_mat, scale, shift)

    # TODO(synk): emit NCHW-ordered tiles directly from pass 2 (or return NHWC) to kill
    # this extra HBM round trip for the layout change.
    return out2d[:M].reshape(N, H, W, Cout).transpose(0, 3, 1, 2)


if __name__ == "__main__":
    N, Cin, H, W = 2, 4, 16, 16
    Cout = 8

    key = jax.random.PRNGKey(0)
    kx, kw, kb, kg, kbeta = jax.random.split(key, 5)

    x = jax.random.normal(kx, (N, Cin, H, W), dtype=jnp.float32)
    weight = jax.random.normal(kw, (Cout, Cin, 3, 3), dtype=jnp.float32) * 0.1
    bias = jax.random.normal(kb, (Cout,), dtype=jnp.float32) * 0.1
    gamma = 1.0 + 0.1 * jax.random.normal(kg, (Cout,), dtype=jnp.float32)
    beta = 0.1 * jax.random.normal(kbeta, (Cout,), dtype=jnp.float32)

    out = inconv_forward(x, weight, bias, gamma, beta)
    jax.block_until_ready(out)
    assert out.shape == (N, Cout, H, W)

    # Loose sanity check vs f32 reference (kernel matmul runs in bf16).
    y = jax.lax.conv_general_dilated(
        x, weight, window_strides=(1, 1), padding=((1, 1), (1, 1)),
        dimension_numbers=("NCHW", "OIHW", "NCHW")) + bias.reshape(1, Cout, 1, 1)
    mean = y.mean(axis=(0, 2, 3), keepdims=True)
    var = ((y - mean) ** 2).mean(axis=(0, 2, 3), keepdims=True)
    ref = jnp.maximum((y - mean) * jax.lax.rsqrt(var + EPS)
                      * gamma.reshape(1, Cout, 1, 1) + beta.reshape(1, Cout, 1, 1), 0.0)
    max_err = float(jnp.max(jnp.abs(out - ref)))
    assert max_err < 1e-1, f"max abs err vs f32 reference: {max_err}"

    print("KERNEL_OK")
</pallas_src>

<mosaic_0001>
module attributes {stable_mosaic.version = 11 : i64} {
  func.func @_stats_kernel(%arg0: i32, %arg1: i32, %arg2: memref<512x36xbf16, #tpu.memory_space<vmem>>, %arg3: memref<36x8xbf16, #tpu.memory_space<vmem>>, %arg4: memref<1x1x8xf32, #tpu.memory_space<vmem>>, %arg5: memref<1x1x8xf32, #tpu.memory_space<vmem>>) attributes {dimension_semantics = [#tpu.dimension_semantics<parallel>, #tpu.dimension_semantics<arbitrary>], iteration_bounds = array<i64: 2, 1>, scalar_prefetch = 0 : i64, scratch_operands = 0 : i64, tpu.core_type = #tpu.core_type<tc>, window_params = [{transform_indices = @transform_0, window_bounds = array<i64: 512, 36>}, {pipeline_mode = #tpu.pipeline_mode<synchronous>, transform_indices = @transform_1, window_bounds = array<i64: 36, 8>}, {transform_indices = @transform_2, window_bounds = array<i64: 1, 1, 8>}, {transform_indices = @transform_3, window_bounds = array<i64: 1, 1, 8>}]} {
    %c0_i32 = arith.constant 0 : i32
    %0 = arith.cmpi eq, %arg1, %c0_i32 : i32
    %1 = arith.extui %0 : i1 to i32
    %c0_i32_0 = arith.constant 0 : i32
    %2 = arith.cmpi ne, %1, %c0_i32_0 : i32
    scf.if %2 {
      %cst_18 = arith.constant 0.000000e+00 : f32
      %19 = vector.broadcast %cst_18 : f32 to vector<1x1x8xf32>
      %c0_19 = arith.constant 0 : index
      %c0_20 = arith.constant 0 : index
      %c0_21 = arith.constant 0 : index
      %20 = vector.load %arg4[%c0_19, %c0_20, %c0_21] : memref<1x1x8xf32, #tpu.memory_space<vmem>>, vector<1x1x8xf32>
      tpu.vector_store %arg4[%c0_19, %c0_20, %c0_21], %19 {strides = array<i32>} : memref<1x1x8xf32, #tpu.memory_space<vmem>>, vector<1x1x8xf32>,
      %cst_22 = arith.constant 0.000000e+00 : f32
      %21 = vector.broadcast %cst_22 : f32 to vector<1x1x8xf32>
      %c0_23 = arith.constant 0 : index
      %c0_24 = arith.constant 0 : index
      %c0_25 = arith.constant 0 : index
      %22 = vector.load %arg5[%c0_23, %c0_24, %c0_25] : memref<1x1x8xf32, #tpu.memory_space<vmem>>, vector<1x1x8xf32>
      tpu.vector_store %arg5[%c0_23, %c0_24, %c0_25], %21 {strides = array<i32>} : memref<1x1x8xf32, #tpu.memory_space<vmem>>, vector<1x1x8xf32>,
    } else {
    }
    %c0 = arith.constant 0 : index
    %c0_1 = arith.constant 0 : index
    %3 = vector.load %arg2[%c0, %c0_1] : memref<512x36xbf16, #tpu.memory_space<vmem>>, vector<512x36xbf16>
    %c0_2 = arith.constant 0 : index
    %c0_3 = arith.constant 0 : index
    %4 = vector.load %arg3[%c0_2, %c0_3] : memref<36x8xbf16, #tpu.memory_space<vmem>>, vector<36x8xbf16>
    %cst = arith.constant dense<0.000000e+00> : vector<512x8xf32>
    %5 = tpu.matmul %3, %4, %cst {dimension_numbers = #tpu.dot_dimension_numbers<[1], [0], [0], [1], [0, 0, 1, 1], [], []>} : vector<512x36xbf16>, vector<36x8xbf16>, vector<512x8xf32> -> vector<512x8xf32>
    %c0_4 = arith.constant 0 : index
    %c0_5 = arith.constant 0 : index
    %c0_6 = arith.constant 0 : index
    %6 = vector.load %arg4[%c0_4, %c0_5, %c0_6] : memref<1x1x8xf32, #tpu.memory_space<vmem>>, vector<1x1x8xf32>
    %cst_7 = arith.constant dense<0.000000e+00> : vector<8xf32>
    %7 = vector.multi_reduction <add>, %5, %cst_7 [0] : vector<512x8xf32> to vector<8xf32>
    %8 = vector.shape_cast %7 : vector<8xf32> to vector<1x8xf32>
    %9 = vector.shape_cast %8 : vector<1x8xf32> to vector<1x1x8xf32>
    %10 = arith.addf %6, %9 : vector<1x1x8xf32>
    %c0_8 = arith.constant 0 : index
    %c0_9 = arith.constant 0 : index
    %c0_10 = arith.constant 0 : index
    %11 = vector.load %arg4[%c0_8, %c0_9, %c0_10] : memref<1x1x8xf32, #tpu.memory_space<vmem>>, vector<1x1x8xf32>
    tpu.vector_store %arg4[%c0_8, %c0_9, %c0_10], %10 {strides = array<i32>} : memref<1x1x8xf32, #tpu.memory_space<vmem>>, vector<1x1x8xf32>,
    %c0_11 = arith.constant 0 : index
    %c0_12 = arith.constant 0 : index
    %c0_13 = arith.constant 0 : index
    %12 = vector.load %arg5[%c0_11, %c0_12, %c0_13] : memref<1x1x8xf32, #tpu.memory_space<vmem>>, vector<1x1x8xf32>
    %13 = arith.mulf %5, %5 : vector<512x8xf32>
    %cst_14 = arith.constant dense<0.000000e+00> : vector<8xf32>
    %14 = vector.multi_reduction <add>, %13, %cst_14 [0] : vector<512x8xf32> to vector<8xf32>
    %15 = vector.shape_cast %14 : vector<8xf32> to vector<1x8xf32>
    %16 = vector.shape_cast %15 : vector<1x8xf32> to vector<1x1x8xf32>
    %17 = arith.addf %12, %16 : vector<1x1x8xf32>
    %c0_15 = arith.constant 0 : index
    %c0_16 = arith.constant 0 : index
    %c0_17 = arith.constant 0 : index
    %18 = vector.load %arg5[%c0_15, %c0_16, %c0_17] : memref<1x1x8xf32, #tpu.memory_space<vmem>>, vector<1x1x8xf32>
    tpu.vector_store %arg5[%c0_15, %c0_16, %c0_17], %17 {strides = array<i32>} : memref<1x1x8xf32, #tpu.memory_space<vmem>>, vector<1x1x8xf32>,
    return
  }
  func.func @transform_0(%arg0: i32, %arg1: i32) -> (i32, i32) {
    %c1_i32 = arith.constant 1 : i32
    %0 = arith.muli %arg0, %c1_i32 : i32
    %1 = arith.addi %0, %arg1 : i32
    %c0_i32 = arith.constant 0 : i32
    %c0_i32_0 = arith.constant 0 : i32
    return %1, %c0_i32 : i32, i32
  }
  func.func @transform_1(%arg0: i32, %arg1: i32) -> (i32, i32) {
    %c0_i32 = arith.constant 0 : i32
    %c0_i32_0 = arith.constant 0 : i32
    %c0_i32_1 = arith.constant 0 : i32
    return %c0_i32, %c0_i32_0 : i32, i32
  }
  func.func @transform_2(%arg0: i32, %arg1: i32) -> (i32, i32, i32) {
    %c0_i32 = arith.constant 0 : i32
    %c0_i32_0 = arith.constant 0 : i32
    %c0_i32_1 = arith.constant 0 : i32
    return %arg0, %c0_i32, %c0_i32_0 : i32, i32, i32
  }
  func.func @transform_3(%arg0: i32, %arg1: i32) -> (i32, i32, i32) {
    %c0_i32 = arith.constant 0 : i32
    %c0_i32_0 = arith.constant 0 : i32
    %c0_i32_1 = arith.constant 0 : i32
    return %arg0, %c0_i32, %c0_i32_0 : i32, i32, i32
  }
}

</mosaic_0001>

<bundles_post_ra>
// kernel: tpu_custom_call.1
= control target key start
LH: loop header
LB: loop body
LE: loop exit
PB: predicated region body
PF: predicated region fallthrough
CT: control target
= control target key end

     0   :  { %9 = vsyncpa [#allocation3], 0  ;;  %s2200_s0 = inlined_call_operand.vmem [shape: bf16[1024,36], index: 0, kind: input, shape index: {}]   ;;  %s2201_s1 = inlined_call_operand.vmem [shape: bf16[36,8], index: 1, kind: input, shape index: {}]   ;;  %s2202_s2 = inlined_call_operand.hbm [shape: f32[2,1,8], index: 2, kind: output, shape index: {0}]   ;;  %s2203_s3 = inlined_call_operand.hbm [shape: f32[2,1,8], index: 3, kind: output, shape index: {1}]  }
   0x1   :  { %11 = vsyncpa [#allocation3 + $0x1], 0 }
   0x2   :  { %12 = vsyncpa [#allocation5], 0 }
   0x3   :  { %14 = vsyncpa [#allocation5 + $0x1], 0  ;;  %s1718_s12 = smov 0   ;;  %s1720_s13 = smov 0  }
   0x4   :  { %s1722_s14 = smov 0   ;;  %s1724_s15 = smov 0  }
   0x5   :  { %s1726_s16 = smov 0   ;;  %s1728_s17 = smov 0  }
   0x6 LB: > { %s1300_s18 = sadd.s32 4294967295, %s1693_s17   ;;  %s1301_s19 = sadd.s32 4294967294, %s1693_s17   ;;  %s1693_s17 = sphi %s1728_s17, %s20_s17   ;;  %s1689_s16 = sphi %s1726_s16, %s2210_s16   ;;  %s1685_s15 = sphi %s1724_s15, %s2209_s15   ;;  %s1681_s14 = sphi %s1722_s14, %s2208_s14   ;;  %s1677_s13 = sphi %s1720_s13, %s2207_s13   ;;  %s1673_s12 = sphi %s1718_s12, %s2206_s12  }
   0x7   : > { %s32_s20 = sadd.s32 1, %s1689_s16  ;;  %s88_s21 = sadd.s32 1, %s1681_s14 }
   0x8   : > { %p34_p0 = scmp.ge.s32.totalorder %s32_s20, 2  ;;  %p98_p1 = scmp.ne.s32.totalorder %s1681_s14, %s1677_s13 }
   0x9   : > { %p99_p2 = scmp.eq.s32.totalorder %s1300_s18, 1  ;;  %p104_p3 = scmp.ne.s32.totalorder %s1677_s13, %s1673_s12 }
   0xa   : > { %s2212_s20 = smov (%p34_p0, %s32_s20), 0  ;;  %p105_p5 = scmp.eq.s32.totalorder %s1301_s19, 1 }
   0xb   : > { %p1758_p4 = por %p99_p2, %p98_p1  ;;  %s85_s23 = ssub.s32 %s1689_s16, %s2212_s20 }
   0xc   : > { %p1304_p6 = scmp.ge.s32.totalorder %s1693_s17, 1  ;;  %p86_p7 = scmp.eq.s32.totalorder %s85_s23, 0 }
   0xd   : > { %p1765_p8 = por %p105_p5, %p104_p3  ;;  %p163_p9 = scmp.lt.s32.totalorder %s1693_s17, 3 }
   0xe   : > { %s1771_s25 = scalar_select %p86_p7, %s1681_s14, %s88_s21  }
   0xf   : > { %p164_p10 = pnand %p1304_p6, %p163_p9 }
  0x10   : > { %s1305_s30 = sshll.u32 (!%p164_p10), %s1685_s15, 6  ;;  %s1856_s10 = sand.u32 (!%p164_p10), 1, %s1677_s13  }
  0x11   : > { %167 = sbr.rel (%p164_p10) target bundleno = 410 (0x19a), region = 28  ;;  %p193_p11 = scmp.lt.s32.totalorder (!%p164_p10), %s1305_s30, 127 }
  0x12   : > { %s1863_s11 = scalar_lea.vmem (!%p164_p10), [#allocation2], %s1856_s10  ;;  %s1868_s18 = scalar_lea.vmem (!%p164_p10), [#allocation4], %s1856_s10 }
  0x13   : > { %s1374_s19 = sshll.u32 (!%p164_p10), %s1685_s15, 4  ;;  %s1196_s21 = sshll.u32 (!%p164_p10), %s1863_s11, 4  ;;  %s2123_s21 = int_to_ptr.vmem [resolvable:$true] %s1196_s21 }
  0x14   : > { %s1209_s23 = sshll.u32 (!%p164_p10), %s1868_s18, 4  ;;  %s2121_s28 = scalar_lea.hbm (!%p164_p10), %s2202_s2, %s1374_s19  ;;  %s2132_s23 = int_to_ptr.vmem [resolvable:$true] %s1209_s23 }
  0x15   : > { %s1180_s4 = scalar_lea.sflag (!%p164_p10), [#allocation3], %s1856_s10  ;;  %s1587_s5 = scalar_lea.vmem (!%p164_p10), %s2123_s21, 16 }
  0x16   : > { %v1552_v0 = vld [vmem:[%s2201_s1 + $0x10] ss:$0 sps:$4 sm:$0x33]   ;;  %vm548_vm0 = vcmask 1041408   ;;  %v1553_v1 = vld [vmem:[%s2201_s1 + $0x8] sm:$0xff]   ;;  %v1554_v3 = vld [vmem:[%s2201_s1] sm:$0xff]   ;;  %p1588_p12 = scmp.ne.s32.totalorder %s2123_s21, %s1587_s5 }
  0x17   : > { %1489 = vmatprep.subr.msk.bf16.mxu0 %vm548_vm0, %v1552_v0  ;;  %v550_v2 = vsel %vm548_vm0, %v1552_v0, 0  ;;  %1490 = vmatprep.subr.msk.bf16.mxu1 %vm548_vm0, %v1552_v0  ;;  %s2214_s30 = smov (!%p193_p11, %s1305_s30), 127  ;;  %vm451_vm1 = vcmask 293888   ;;  %vm842_vm2 = vcmask 64512   ;;  %vm204_vm3 = vcmask 57344  }
  0x18   : > { %1414 = vmatpush3.bf16.msra.mxu0 %v550_v2  ;;  %1486 = vmatpush3.bf16.msra.mxu1 %v550_v2  ;;  %s1306_s6 = sshll.u32 %s2214_s30, 2  ;;  %v1695_v57 = vmov 0.0   ;;  %s2130_s30 = scalar_lea.hbm %s2203_s3, %s1374_s19 }
  0x19   : > { %1415 = vmatprep.subr.bf16.mxu0 %v1553_v1  ;;  %1484 = vmatprep.subr.bf16.mxu1 %v1553_v1  ;;  %s1786_s9 = scalar_lea.vmem %s2200_s0, %s1306_s6  ;;  %205 = vst.msk [vmem:[%s1863_s11] sm:$0x1] %vm204_vm3, %v1695_v57  ;;  %206 = vst.msk [vmem:[%s1868_s18] sm:$0x1] %vm204_vm3, %v1695_v57  ;;  %p1589_p13 = pnand %p1588_p12, %p1758_p4 }
  0x1a   : > { %v1555_v4 = vld [vmem:[%s1786_s9] sm:$0xff]   ;;  %v1556_v5 = vld [vmem:[%s1786_s9 + $0x8] sm:$0xff]   ;;  %v1557_v6 = vld [vmem:[%s1786_s9 + $0x10] sm:$0xff]   ;;  %s1696_s6 = smov [#allocation2]  }
  0x1b   : > { %1419 = vmatprep.mubr.msk.bf16.mxu0 %vm451_vm1, %v1555_v4  ;;  %v1558_v7 = vld [vmem:[%s1786_s9 + $0x18] sm:$0xff]   ;;  %v1559_v8 = vld [vmem:[%s1786_s9 + $0x20] sm:$0xff]   ;;  %v1560_v9 = vld [vmem:[%s1786_s9 + $0x28] sm:$0xff]   ;;  %p1590_p0 = pneg %p1589_p13  ;;  %s1591_s7 = sshll.u32 %s1696_s6, 4  ;;  %s1592_s7 = int_to_ptr.vmem [resolvable:$false] %s1591_s7 }
  0x1c   : > { %1416 = vmatpush3.bf16.msra.mxu0 %v1553_v1  ;;  %1487 = vmatpush3.bf16.msra.mxu1 %v1553_v1  ;;  %v1561_v10 = vld [vmem:[%s1786_s9 + $0x30] sm:$0xff]   ;;  %v1571_v11 = vld [vmem:[%s1786_s9 + $0x80] sm:$0xff]   ;;  %v1572_v12 = vld [vmem:[%s1786_s9 + $0x88] sm:$0xff]   ;;  %s1593_s8 = scalar_lea.vmem %s1592_s7, 32  ;;  %p1594_p1 = scmp.lt.s32.totalorder %s2123_s21, %s1592_s7 }
  0x1d   : > { %1417 = vmatprep.subr.bf16.mxu0 %v1554_v3  ;;  %1485 = vmatprep.subr.bf16.mxu1 %v1554_v3  ;;  %v1573_v13 = vld [vmem:[%s1786_s9 + $0x90] sm:$0xff]   ;;  %v1574_v14 = vld [vmem:[%s1786_s9 + $0x98] sm:$0xff]   ;;  %v1575_v15 = vld [vmem:[%s1786_s9 + $0xa0] sm:$0xff]   ;;  %p1595_p2 = scmp.lt.s32.totalorder %s1593_s8, %s1587_s5 }
  0x1e   : > { %1451 = vmatprep.mubr.msk.bf16.mxu1 %vm451_vm1, %v1571_v11  ;;  %v1562_v16 = vld [vmem:[%s1786_s9 + $0x38] sm:$0xff]   ;;  %v1563_v17 = vld [vmem:[%s1786_s9 + $0x40] sm:$0xff]   ;;  %v1576_v18 = vld [vmem:[%s1786_s9 + $0xa8] sm:$0xff]  }
  0x1f   : > { %v1577_v19 = vld [vmem:[%s1786_s9 + $0xb0] sm:$0xff]   ;;  %v1564_v20 = vld [vmem:[%s1786_s9 + $0x48] sm:$0xff]   ;;  %v1578_v22 = vld [vmem:[%s1786_s9 + $0xb8] sm:$0xff]   ;;  %p1596_p3 = por %p1595_p2, %p1594_p1 }
  0x20   : > { %1418 = vmatpush3.bf16.msra.mxu0 %v1554_v3  ;;  %1488 = vmatpush3.bf16.msra.mxu1 %v1554_v3  ;;  %v1565_v21 = vld [vmem:[%s1786_s9 + $0x50] sm:$0xff]   ;;  %v1579_v23 = vld [vmem:[%s1786_s9 + $0xc0] sm:$0xff]   ;;  %v1566_v24 = vld [vmem:[%s1786_s9 + $0x58] sm:$0xff]  }
  0x21   : > { %v1567_v25 = vld [vmem:[%s1786_s9 + $0x60] sm:$0xff]   ;;  %v1580_v26 = vld [vmem:[%s1786_s9 + $0xc8] sm:$0xff]   ;;  %v1581_v27 = vld [vmem:[%s1786_s9 + $0xd0] sm:$0xff]   ;;  %p1597_p5 = pnand %p1596_p3, %p1590_p0 }
  0x22   : > { %v1568_v28 = vld [vmem:[%s1786_s9 + $0x68] sm:$0xff]   ;;  %v1569_v29 = vld [vmem:[%s1786_s9 + $0x70] sm:$0xff]   ;;  %v1582_v30 = vld [vmem:[%s1786_s9 + $0xd8] sm:$0xff]  }
  0x23   : > { %1420 = vmatmul.mubr.msk.bf16.vlgmr.msra.gmra.mxu0 %vm451_vm1, %v1556_v5  ;;  %1452 = vmatmul.mubr.msk.bf16.vlgmr.msra.gmra.mxu1 %vm451_vm1, %v1572_v12  ;;  %v1583_v31 = vld [vmem:[%s1786_s9 + $0xe0] sm:$0xff]   ;;  %v1570_v32 = vld [vmem:[%s1786_s9 + $0x78] sm:$0xff]   ;;  %v1584_v33 = vld [vmem:[%s1786_s9 + $0xe8] sm:$0xff]  }
  0x24   : > { %1423 = vmatprep.mubr.msk.bf16.mxu0 %vm451_vm1, %v1557_v6  ;;  %1455 = vmatprep.mubr.msk.bf16.mxu1 %vm451_vm1, %v1573_v13  ;;  %v1585_v34 = vld [vmem:[%s1786_s9 + $0xf0] sm:$0xff]   ;;  %v1586_v35 = vld [vmem:[%s1786_s9 + $0xf8] sm:$0xff]  }
  0x2b   : > { %1424 = vmatmul.mubr.msk.bf16.gmra.mxu0 %vm451_vm1, %v1558_v7  ;;  %1456 = vmatmul.mubr.msk.bf16.gmra.mxu1 %vm451_vm1, %v1574_v14 }
  0x2c   : > { %1427 = vmatprep.mubr.msk.bf16.mxu0 %vm451_vm1, %v1559_v8  ;;  %1459 = vmatprep.mubr.msk.bf16.mxu1 %vm451_vm1, %v1575_v15 }
  0x33   : > { %1428 = vmatmul.mubr.msk.bf16.gmra.mxu0 %vm451_vm1, %v1560_v9  ;;  %1460 = vmatmul.mubr.msk.bf16.gmra.mxu1 %vm451_vm1, %v1576_v18 }
  0x34   : > { %1431 = vmatprep.mubr.msk.bf16.mxu0 %vm451_vm1, %v1561_v10  ;;  %1463 = vmatprep.mubr.msk.bf16.mxu1 %vm451_vm1, %v1577_v19 }
  0x3b   : > { %1432 = vmatmul.mubr.msk.bf16.gmra.mxu0 %vm451_vm1, %v1562_v16  ;;  %1464 = vmatmul.mubr.msk.bf16.gmra.mxu1 %vm451_vm1, %v1578_v22 }
  0x3c   : > { %1435 = vmatprep.mubr.msk.bf16.mxu0 %vm451_vm1, %v1563_v17  ;;  %1467 = vmatprep.mubr.msk.bf16.mxu1 %vm451_vm1, %v1579_v23 }
  0x43   : > { %1436 = vmatmul.mubr.msk.bf16.gmra.mxu0 %vm451_vm1, %v1564_v20  ;;  %1468 = vmatmul.mubr.msk.bf16.gmra.mxu1 %vm451_vm1, %v1580_v26 }
  0x44   : > { %1439 = vmatprep.mubr.msk.bf16.mxu0 %vm451_vm1, %v1565_v21  ;;  %1471 = vmatprep.mubr.msk.bf16.mxu1 %vm451_vm1, %v1581_v27 }
  0x4b   : > { %1440 = vmatmul.mubr.msk.bf16.gmra.mxu0 %vm451_vm1, %v1566_v24  ;;  %1472 = vmatmul.mubr.msk.bf16.gmra.mxu1 %vm451_vm1, %v1582_v30 }
  0x4c   : > { %1443 = vmatprep.mubr.msk.bf16.mxu0 %vm451_vm1, %v1567_v25  ;;  %1475 = vmatprep.mubr.msk.bf16.mxu1 %vm451_vm1, %v1583_v31 }
  0x53   : > { %1444 = vmatmul.mubr.msk.bf16.gmra.mxu0 %vm451_vm1, %v1568_v28  ;;  %1476 = vmatmul.mubr.msk.bf16.gmra.mxu1 %vm451_vm1, %v1584_v33 }
  0x54   : > { %1447 = vmatprep.mubr.msk.bf16.mxu0 %vm451_vm1, %v1569_v29  ;;  %1479 = vmatprep.mubr.msk.bf16.mxu1 %vm451_vm1, %v1585_v34 }
  0x5b   : > { %1448 = vmatmul.mubr.msk.bf16.gmra.mxu0 %vm451_vm1, %v1570_v32  ;;  %1480 = vmatmul.mubr.msk.bf16.gmra.mxu1 %vm451_vm1, %v1586_v35 }
  0xe3   : > { %v1421_v36 = vpop.f32.mrf.mxu0  ;;  %v1874_v2 = vpop.f32.mrf.mxu1 }
  0xe4   : > { %v982_v41 = vmul.f32 %v1421_v36, %v1421_v36  ;;  %v846_v45 = vsel %vm842_vm2, %v1421_v36, 0.0 }
  0xe5   : > { %v586_v37 = vpop.f32.mrf.mxu0  ;;  %v1878_v10 = vpop.f32.mrf.mxu1 }
  0xe6   : > { %v980_v39 = vmul.f32 %v586_v37, %v586_v37  ;;  %v843_v42 = vsel %vm842_vm2, %v586_v37, 0.0  ;;  %v1047_v54 = vsel %vm842_vm2, %v982_v41, 0.0 }
  0xe7   : > { %v1422_v38 = vpop.f32.mrf.mxu0  ;;  %v1882_v17 = vpop.f32.mrf.mxu1 }
  0xe8   : > { %v1044_v48 = vsel %vm842_vm2, %v980_v39, 0.0  ;;  %v983_v49 = vmul.f32 %v1422_v38, %v1422_v38  ;;  %v848_v55 = vsel %vm842_vm2, %v1422_v38, 0.0 }
  0xe9   : > { %v589_v40 = vpop.f32.mrf.mxu0  ;;  %v1886_v24 = vpop.f32.mrf.mxu1 }
  0xea   : > { %v844_v43 = vsel %vm842_vm2, %v589_v40, 0.0  ;;  %v981_v44 = vmul.f32 %v589_v40, %v589_v40  ;;  %v1049_v61 = vsel %vm842_vm2, %v983_v49, 0.0 }
  0xeb   : > { %v845_v46 = vadd.f32 %v844_v43, %v843_v42  ;;  %v1425_v47 = vpop.f32.mrf.mxu0  ;;  %v1890_v30 = vpop.f32.mrf.mxu1 }
  0xec   : > { %v1045_v50 = vsel %vm842_vm2, %v981_v44, 0.0  ;;  %v986_v3 = vmul.f32 %v1425_v47, %v1425_v47  ;;  %v854_v11 = vsel %vm842_vm2, %v1425_v47, 0.0 }
  0xed   : > { %v847_v51 = vadd.f32 %v846_v45, %v845_v46  ;;  %v1046_v52 = vadd.f32 %v1045_v50, %v1044_v48  ;;  %v602_v53 = vpop.f32.mrf.mxu0  ;;  %v1894_v38 = vpop.f32.mrf.mxu1 }
  0xee   : > { %v984_v56 = vmul.f32 %v602_v53, %v602_v53  ;;  %v850_v62 = vsel %vm842_vm2, %v602_v53, 0.0  ;;  %v1055_v18 = vsel %vm842_vm2, %v986_v3, 0.0 }
  0xef   : > { %v1048_v58 = vadd.f32 %v1047_v54, %v1046_v52  ;;  %v849_v59 = vadd.f32 %v848_v55, %v847_v51  ;;  %v1426_v60 = vpop.f32.mrf.mxu0  ;;  %v1898_v45 = vpop.f32.mrf.mxu1 }
  0xf0   : > { %v1051_v4 = vsel %vm842_vm2, %v984_v56, 0.0  ;;  %v987_v12 = vmul.f32 %v1426_v60, %v1426_v60  ;;  %v856_v19 = vsel %vm842_vm2, %v1426_v60, 0.0 }
  0xf1   : > { %v851_v63 = vadd.f32 %v850_v62, %v849_v59  ;;  %v1050_v0 = vadd.f32 %v1049_v61, %v1048_v58  ;;  %v605_v1 = vpop.f32.mrf.mxu0  ;;  %v1902_v52 = vpop.f32.mrf.mxu1 }
  0xf2   : > { %v852_v5 = vsel %vm842_vm2, %v605_v1, 0.0  ;;  %v985_v6 = vmul.f32 %v605_v1, %v605_v1  ;;  %v1057_v25 = vsel %vm842_vm2, %v987_v12, 0.0 }
  0xf3   : > { %v1052_v7 = vadd.f32 %v1051_v4, %v1050_v0  ;;  %v853_v8 = vadd.f32 %v852_v5, %v851_v63  ;;  %v1429_v9 = vpop.f32.mrf.mxu0  ;;  %v1906_v58 = vpop.f32.mrf.mxu1 }
  0xf4   : > { %v1053_v13 = vsel %vm842_vm2, %v985_v6, 0.0  ;;  %v990_v31 = vmul.f32 %v1429_v9, %v1429_v9  ;;  %v862_v39 = vsel %vm842_vm2, %v1429_v9, 0.0 }
  0xf5   : > { %v855_v14 = vadd.f32 %v854_v11, %v853_v8  ;;  %v1054_v15 = vadd.f32 %v1053_v13, %v1052_v7  ;;  %v618_v16 = vpop.f32.mrf.mxu0  ;;  %v1912_v9 = vpop.f32.mrf.mxu1 }
  0xf6   : > { %v988_v20 = vmul.f32 %v618_v16, %v618_v16  ;;  %v858_v26 = vsel %vm842_vm2, %v618_v16, 0.0  ;;  %v1063_v46 = vsel %vm842_vm2, %v990_v31, 0.0 }
  0xf7   : > { %v1056_v21 = vadd.f32 %v1055_v18, %v1054_v15  ;;  %v857_v22 = vadd.f32 %v856_v19, %v855_v14  ;;  %v1430_v23 = vpop.f32.mrf.mxu0 }
  0xf8   : > { %v1059_v32 = vsel %vm842_vm2, %v988_v20, 0.0  ;;  %v991_v40 = vmul.f32 %v1430_v23, %v1430_v23  ;;  %v864_v47 = vsel %vm842_vm2, %v1430_v23, 0.0  ;;  %v1918_v23 = vpop.f32.mrf.mxu1 }
  0xf9   : > { %v859_v27 = vadd.f32 %v858_v26, %v857_v22  ;;  %v1058_v28 = vadd.f32 %v1057_v25, %v1056_v21  ;;  %v621_v29 = vpop.f32.mrf.mxu0 }
  0xfa   : > { %v860_v33 = vsel %vm842_vm2, %v621_v29, 0.0  ;;  %v989_v34 = vmul.f32 %v621_v29, %v621_v29  ;;  %v1065_v53 = vsel %vm842_vm2, %v991_v40, 0.0  ;;  %v1924_v40 = vpop.f32.mrf.mxu1 }
  0xfb   : > { %v1060_v35 = vadd.f32 %v1059_v32, %v1058_v28  ;;  %v861_v36 = vadd.f32 %v860_v33, %v859_v27  ;;  %v1433_v37 = vpop.f32.mrf.mxu0 }
  0xfc   : > { %v1061_v41 = vsel %vm842_vm2, %v989_v34, 0.0  ;;  %v994_v59 = vmul.f32 %v1433_v37, %v1433_v37  ;;  %v870_v3 = vsel %vm842_vm2, %v1433_v37, 0.0 }
  0xfd   : > { %v863_v42 = vadd.f32 %v862_v39, %v861_v36  ;;  %v1062_v43 = vadd.f32 %v1061_v41, %v1060_v35  ;;  %v634_v44 = vpop.f32.mrf.mxu0 }
  0xfe   : > { %v992_v48 = vmul.f32 %v634_v44, %v634_v44  ;;  %v866_v54 = vsel %vm842_vm2, %v634_v44, 0.0  ;;  %v1071_v11 = vsel %vm842_vm2, %v994_v59, 0.0 }
  0xff   : > { %v1064_v49 = vadd.f32 %v1063_v46, %v1062_v43  ;;  %v865_v50 = vadd.f32 %v864_v47, %v863_v42  ;;  %v1434_v51 = vpop.f32.mrf.mxu0 }
 0x100   : > { %v1067_v60 = vsel %vm842_vm2, %v992_v48, 0.0  ;;  %v995_v4 = vmul.f32 %v1434_v51, %v1434_v51  ;;  %v872_v12 = vsel %vm842_vm2, %v1434_v51, 0.0 }
 0x101   : > { %v867_v55 = vadd.f32 %v866_v54, %v865_v50  ;;  %v1066_v56 = vadd.f32 %v1065_v53, %v1064_v49  ;;  %v637_v57 = vpop.f32.mrf.mxu0  ;;  %v1930_v54 = vpop.f32.mrf.mxu1 }
 0x102   : > { %v868_v61 = vsel %vm842_vm2, %v637_v57, 0.0  ;;  %v993_v62 = vmul.f32 %v637_v57, %v637_v57  ;;  %v1073_v18 = vsel %vm842_vm2, %v995_v4, 0.0 }
 0x103   : > { %v1068_v63 = vadd.f32 %v1067_v60, %v1066_v56  ;;  %v869_v0 = vadd.f32 %v868_v61, %v867_v55  ;;  %v1437_v1 = vpop.f32.mrf.mxu0 }
 0x104   : > { %v1069_v5 = vsel %vm842_vm2, %v993_v62, 0.0  ;;  %v998_v25 = vmul.f32 %v1437_v1, %v1437_v1  ;;  %v878_v33 = vsel %vm842_vm2, %v1437_v1, 0.0 }
 0x105   : > { %v871_v6 = vadd.f32 %v870_v3, %v869_v0  ;;  %v1070_v7 = vadd.f32 %v1069_v5, %v1068_v63  ;;  %v650_v8 = vpop.f32.mrf.mxu0 }
 0x106   : > { %v996_v13 = vmul.f32 %v650_v8, %v650_v8  ;;  %v874_v19 = vsel %vm842_vm2, %v650_v8, 0.0  ;;  %v1079_v41 = vsel %vm842_vm2, %v998_v25, 0.0 }
 0x107   : > { %v1072_v14 = vadd.f32 %v1071_v11, %v1070_v7  ;;  %v873_v15 = vadd.f32 %v872_v12, %v871_v6  ;;  %v1438_v16 = vpop.f32.mrf.mxu0  ;;  %v1936_v6 = vpop.f32.mrf.mxu1 }
 0x108   : > { %v1075_v26 = vsel %vm842_vm2, %v996_v13, 0.0  ;;  %v999_v34 = vmul.f32 %v1438_v16, %v1438_v16  ;;  %v880_v42 = vsel %vm842_vm2, %v1438_v16, 0.0 }
 0x109   : > { %v875_v20 = vadd.f32 %v874_v19, %v873_v15  ;;  %v1074_v21 = vadd.f32 %v1073_v18, %v1072_v14  ;;  %v653_v22 = vpop.f32.mrf.mxu0 }
 0x10a   : > { %v876_v27 = vsel %vm842_vm2, %v653_v22, 0.0  ;;  %v997_v28 = vmul.f32 %v653_v22, %v653_v22  ;;  %v1081_v48 = vsel %vm842_vm2, %v999_v34, 0.0 }
 0x10b   : > { %v1076_v29 = vadd.f32 %v1075_v26, %v1074_v21  ;;  %v877_v31 = vadd.f32 %v876_v27, %v875_v20  ;;  %v1441_v32 = vpop.f32.mrf.mxu0  ;;  %v1942_v21 = vpop.f32.mrf.mxu1 }
 0x10c   : > { %v1077_v35 = vsel %vm842_vm2, %v997_v28, 0.0  ;;  %v1002_v55 = vmul.f32 %v1441_v32, %v1441_v32  ;;  %v886_v63 = vsel %vm842_vm2, %v1441_v32, 0.0 }
 0x10d   : > { %v879_v36 = vadd.f32 %v878_v33, %v877_v31  ;;  %v1078_v37 = vadd.f32 %v1077_v35, %v1076_v29  ;;  %v666_v39 = vpop.f32.mrf.mxu0 }
 0x10e   : > { %v1000_v43 = vmul.f32 %v666_v39, %v666_v39  ;;  %v882_v49 = vsel %vm842_vm2, %v666_v39, 0.0  ;;  %v1087_v7 = vsel %vm842_vm2, %v1002_v55, 0.0  ;;  %v1948_v39 = vpop.f32.mrf.mxu1 }
 0x10f   : > { %v1080_v44 = vadd.f32 %v1079_v41, %v1078_v37  ;;  %v881_v46 = vadd.f32 %v880_v42, %v879_v36  ;;  %v1442_v47 = vpop.f32.mrf.mxu0 }
 0x110   : > { %v1083_v56 = vsel %vm842_vm2, %v1000_v43, 0.0  ;;  %v1003_v0 = vmul.f32 %v1442_v47, %v1442_v47  ;;  %v888_v8 = vsel %vm842_vm2, %v1442_v47, 0.0  ;;  %v1954_v55 = vpop.f32.mrf.mxu1 }
 0x111   : > { %v883_v50 = vadd.f32 %v882_v49, %v881_v46  ;;  %v1082_v51 = vadd.f32 %v1081_v48, %v1080_v44  ;;  %v669_v53 = vpop.f32.mrf.mxu0 }
 0x112   : > { %v884_v57 = vsel %vm842_vm2, %v669_v53, 0.0  ;;  %v1001_v59 = vmul.f32 %v669_v53, %v669_v53  ;;  %v1089_v15 = vsel %vm842_vm2, %v1003_v0, 0.0 }
 0x113   : > { %v1084_v60 = vadd.f32 %v1083_v56, %v1082_v51  ;;  %v885_v61 = vadd.f32 %v884_v57, %v883_v50  ;;  %v1445_v62 = vpop.f32.mrf.mxu0 }
 0x114   : > { %v1085_v1 = vsel %vm842_vm2, %v1001_v59, 0.0  ;;  %v1006_v22 = vmul.f32 %v1445_v62, %v1445_v62  ;;  %v894_v32 = vsel %vm842_vm2, %v1445_v62, 0.0 }
 0x115   : > { %v887_v3 = vadd.f32 %v886_v63, %v885_v61  ;;  %v1086_v4 = vadd.f32 %v1085_v1, %v1084_v60  ;;  %v682_v5 = vpop.f32.mrf.mxu0 }
 0x116   : > { %v1004_v11 = vmul.f32 %v682_v5, %v682_v5  ;;  %v890_v16 = vsel %vm842_vm2, %v682_v5, 0.0  ;;  %v1095_v41 = vsel %vm842_vm2, %v1006_v22, 0.0  ;;  %v1960_v5 = vpop.f32.mrf.mxu1  ;;  %v1014_v22 = vmul.f32 %v1874_v2, %v1874_v2 }
 0x117   : > { %v1088_v12 = vadd.f32 %v1087_v7, %v1086_v4  ;;  %v889_v13 = vadd.f32 %v888_v8, %v887_v3  ;;  %v1446_v14 = vpop.f32.mrf.mxu0 }
 0x118   : > { %v1091_v25 = vsel %vm842_vm2, %v1004_v11, 0.0  ;;  %v1007_v33 = vmul.f32 %v1446_v14, %v1446_v14  ;;  %v896_v42 = vsel %vm842_vm2, %v1446_v14, 0.0  ;;  %v1012_v11 = vmul.f32 %v1878_v10, %v1878_v10 }
 0x119   : > { %v891_v18 = vadd.f32 %v890_v16, %v889_v13  ;;  %v1090_v19 = vadd.f32 %v1089_v15, %v1088_v12  ;;  %v685_v20 = vpop.f32.mrf.mxu0  ;;  %v906_v15 = vsel %vm842_vm2, %v1878_v10, 0.0  ;;  %v1013_v16 = vmul.f32 %v1886_v24, %v1886_v24 }
 0x11a   : > { %v892_v26 = vsel %vm842_vm2, %v685_v20, 0.0  ;;  %v1005_v27 = vmul.f32 %v685_v20, %v685_v20  ;;  %v1097_v48 = vsel %vm842_vm2, %v1007_v33, 0.0  ;;  %v1971_v20 = vpop.f32.mrf.mxu1  ;;  %v910_v10 = vsel %vm842_vm2, %v1874_v2, 0.0 }
 0x11b   : > { %v1092_v28 = vadd.f32 %v1091_v25, %v1090_v19  ;;  %v893_v29 = vadd.f32 %v892_v26, %v891_v18  ;;  %v1449_v31 = vpop.f32.mrf.mxu0  ;;  %v1107_v25 = vsel %vm842_vm2, %v1012_v11, 0.0  ;;  %v908_v26 = vsel %vm842_vm2, %v1886_v24, 0.0 }
 0x11c   : > { %v1093_v34 = vsel %vm842_vm2, %v1005_v27, 0.0  ;;  %v1010_v56 = vmul.f32 %v1449_v31, %v1449_v31  ;;  %v902_v63 = vsel %vm842_vm2, %v1449_v31, 0.0  ;;  %v1109_v31 = vsel %vm842_vm2, %v1013_v16, 0.0 }
 0x11d   : > { %v895_v35 = vadd.f32 %v894_v32, %v893_v29  ;;  %v1094_v36 = vadd.f32 %v1093_v34, %v1092_v28  ;;  %v698_v37 = vpop.f32.mrf.mxu0  ;;  %v1015_v29 = vmul.f32 %v1882_v17, %v1882_v17  ;;  %v1983_v34 = vpop.f32.mrf.mxu1  ;;  %v1016_v24 = vmul.f32 %v1894_v38, %v1894_v38 }
 0x11e   : > { %v1008_v43 = vmul.f32 %v698_v37, %v698_v37  ;;  %v898_v49 = vsel %vm842_vm2, %v698_v37, 0.0  ;;  %v1103_v7 = vsel %vm842_vm2, %v1010_v56, 0.0 }
 0x11f   : > { %v1096_v44 = vadd.f32 %v1095_v41, %v1094_v36  ;;  %v897_v46 = vadd.f32 %v896_v42, %v895_v35  ;;  %v1450_v47 = vpop.f32.mrf.mxu0  ;;  %v1111_v35 = vsel %vm842_vm2, %v1014_v22, 0.0  ;;  %v912_v36 = vsel %vm842_vm2, %v1882_v17, 0.0 }
 0x120   : > { %v1099_v57 = vsel %vm842_vm2, %v1008_v43, 0.0  ;;  %v1011_v0 = vmul.f32 %v1450_v47, %v1450_v47  ;;  %v904_v8 = vsel %vm842_vm2, %v1450_v47, 0.0  ;;  %v1113_v2 = vsel %vm842_vm2, %v1015_v29, 0.0  ;;  %v1995_v47 = vpop.f32.mrf.mxu1 }
 0x121   : > { %v899_v50 = vadd.f32 %v898_v49, %v897_v46  ;;  %v1098_v51 = vadd.f32 %v1097_v48, %v1096_v44  ;;  %v701_v53 = vpop.f32.mrf.mxu0  ;;  %v914_v42 = vsel %vm842_vm2, %v1894_v38, 0.0  ;;  %v1017_v43 = vmul.f32 %v1902_v52, %v1902_v52 }
 0x122   : > { %v900_v59 = vsel %vm842_vm2, %v701_v53, 0.0  ;;  %v1009_v60 = vmul.f32 %v701_v53, %v701_v53  ;;  %v1105_v14 = vsel %vm842_vm2, %v1011_v0, 0.0  ;;  %v1018_v17 = vmul.f32 %v1890_v30, %v1890_v30 }
 0x123   : > { %v1100_v61 = vadd.f32 %v1099_v57, %v1098_v51  ;;  %v901_v62 = vadd.f32 %v900_v59, %v899_v50  ;;  %v1115_v48 = vsel %vm842_vm2, %v1016_v24, 0.0  ;;  %v916_v49 = vsel %vm842_vm2, %v1902_v52, 0.0 }
 0x124   : > { %v1101_v1 = vsel %vm842_vm2, %v1009_v60, 0.0  ;;  %v918_v38 = vsel %vm842_vm2, %v1890_v30, 0.0  ;;  %v1019_v53 = vmul.f32 %v1898_v45, %v1898_v45  ;;  %v1117_v56 = vsel %vm842_vm2, %v1017_v43, 0.0  ;;  %v2007_v60 = vpop.f32.mrf.mxu1 }
 0x125   : > { %v903_v3 = vadd.f32 %v902_v63, %v901_v62  ;;  %v1102_v4 = vadd.f32 %v1101_v1, %v1100_v61  ;;  %v1119_v61 = vsel %vm842_vm2, %v1018_v17, 0.0  ;;  %v920_v62 = vsel %vm842_vm2, %v1898_v45, 0.0 }
 0x126   : > { %v1020_v52 = vmul.f32 %v1912_v9, %v1912_v9  ;;  %v1121_v30 = vsel %vm842_vm2, %v1019_v53, 0.0  ;;  %v922_v1 = vsel %vm842_vm2, %v1912_v9, 0.0  ;;  %v1022_v45 = vmul.f32 %v1906_v58, %v1906_v58 }
 0x127   : > { %v905_v12 = vadd.f32 %v904_v8, %v903_v3  ;;  %v1104_v13 = vadd.f32 %v1103_v7, %v1102_v4  ;;  %v1021_v3 = vmul.f32 %v1924_v40, %v1924_v40  ;;  %v2019_v8 = vpop.f32.mrf.mxu1  ;;  %v926_v9 = vsel %vm842_vm2, %v1906_v58, 0.0 }
 0x128   : > { %v1123_v11 = vsel %vm842_vm2, %v1020_v52, 0.0  ;;  %v1025_v29 = vmul.f32 %v1948_v39, %v1948_v39  ;;  %v936_v17 = vsel %vm842_vm2, %v1942_v21, 0.0  ;;  %v942_v52 = vsel %vm842_vm2, %v1954_v55, 0.0 }
 0x129   : > { %v1106_v18 = vadd.f32 %v1105_v14, %v1104_v13  ;;  %v907_v19 = vadd.f32 %v906_v15, %v905_v12  ;;  %v924_v12 = vsel %vm842_vm2, %v1924_v40, 0.0  ;;  %v1023_v15 = vmul.f32 %v1918_v23, %v1918_v23  ;;  %v797_v22 = vpop.f32.mrf.mxu1 }
 0x12a   : > { %v1125_v16 = vsel %vm842_vm2, %v1021_v3, 0.0  ;;  %v1024_v40 = vmul.f32 %v1936_v6, %v1936_v6 }
 0x12b   : > { %v909_v27 = vadd.f32 %v908_v26, %v907_v19  ;;  %v1108_v28 = vadd.f32 %v1107_v25, %v1106_v18  ;;  %v1127_v25 = vsel %vm842_vm2, %v1022_v45, 0.0  ;;  %v928_v26 = vsel %vm842_vm2, %v1918_v23, 0.0 }
 0x12c   : > { %v1129_v58 = vsel %vm842_vm2, %v1023_v15, 0.0  ;;  %v1026_v23 = vmul.f32 %v1930_v54, %v1930_v54  ;;  %v1034_v15 = vmul.f32 %v1995_v47, %v1995_v47 }
 0x12d   : > { %v911_v32 = vadd.f32 %v910_v10, %v909_v27  ;;  %v1110_v33 = vadd.f32 %v1109_v31, %v1108_v28  ;;  %v930_v10 = vsel %vm842_vm2, %v1936_v6, 0.0  ;;  %v934_v6 = vsel %vm842_vm2, %v1930_v54, 0.0 }
 0x12f   : > { %v1112_v37 = vadd.f32 %v1111_v35, %v1110_v33  ;;  %v913_v41 = vadd.f32 %v912_v36, %v911_v32  ;;  %v2041_v33 = vpop.f32.mrf.mxu1  ;;  %v1131_v35 = vsel %vm842_vm2, %v1024_v40, 0.0  ;;  %v932_v36 = vsel %vm842_vm2, %v1948_v39, 0.0 }
 0x130   : > { %v1028_v39 = vmul.f32 %v1960_v5, %v1960_v5 }
 0x131   : > { %v915_v44 = vadd.f32 %v914_v42, %v913_v41  ;;  %v1114_v46 = vadd.f32 %v1113_v2, %v1112_v37  ;;  %v1027_v41 = vmul.f32 %v1942_v21, %v1942_v21  ;;  %v1133_v2 = vsel %vm842_vm2, %v1025_v29, 0.0 }
 0x132   : > { %v1139_v21 = vsel %vm842_vm2, %v1028_v39, 0.0 }
 0x133   : > { %v1116_v50 = vadd.f32 %v1115_v48, %v1114_v46  ;;  %v917_v51 = vadd.f32 %v916_v49, %v915_v44  ;;  %v810_v44 = vpop.f32.mrf.mxu1  ;;  %v1135_v46 = vsel %vm842_vm2, %v1026_v23, 0.0  ;;  %v1137_v54 = vsel %vm842_vm2, %v1027_v41, 0.0 }
 0x134   : > { %v1036_v29 = vmul.f32 %v810_v44, %v810_v44 }
 0x135   : > { %v919_v57 = vadd.f32 %v918_v38, %v917_v51  ;;  %v1118_v59 = vadd.f32 %v1117_v56, %v1116_v50  ;;  %v938_v50 = vsel %vm842_vm2, %v1960_v5, 0.0  ;;  %v1029_v51 = vmul.f32 %v1983_v34, %v1983_v34  ;;  %v1478_v56 = vpop.f32.mrf.mxu1 }
 0x136   : > { %v1031_v5 = vmul.f32 %v1971_v20, %v1971_v20 }
 0x137   : > { %v1120_v63 = vadd.f32 %v1119_v61, %v1118_v59  ;;  %v921_v0 = vadd.f32 %v920_v62, %v919_v57  ;;  %v1030_v57 = vmul.f32 %v1954_v55, %v1954_v55  ;;  %v940_v59 = vsel %vm842_vm2, %v1983_v34, 0.0 }
 0x138   : > { %v1032_v34 = vmul.f32 %v2007_v60, %v2007_v60  ;;  %v1145_v55 = vsel %vm842_vm2, %v1031_v5, 0.0 }
 0x139   : > { %v923_v4 = vadd.f32 %v922_v1, %v921_v0  ;;  %v1122_v7 = vadd.f32 %v1121_v30, %v1120_v63  ;;  %v1141_v63 = vsel %vm842_vm2, %v1029_v51, 0.0  ;;  %v813_v1 = vpop.f32.mrf.mxu1  ;;  %v1143_v3 = vsel %vm842_vm2, %v1030_v57, 0.0 }
 0x13a   : > { %v1037_v23 = vmul.f32 %v813_v1, %v813_v1  ;;  %v956_v41 = vsel %vm842_vm2, %v813_v1, 0.0 }
 0x13b   : > { %v1124_v13 = vadd.f32 %v1123_v11, %v1122_v7  ;;  %v925_v14 = vadd.f32 %v924_v12, %v923_v4  ;;  %v944_v4 = vsel %vm842_vm2, %v1971_v20, 0.0  ;;  %v946_v11 = vsel %vm842_vm2, %v2007_v60, 0.0 }
 0x13c   : > { %v1033_v12 = vmul.f32 %v797_v22, %v797_v22  ;;  %v948_v20 = vsel %vm842_vm2, %v797_v22, 0.0 }
 0x13d   : > { %v927_v18 = vadd.f32 %v926_v9, %v925_v14  ;;  %v1126_v19 = vadd.f32 %v1125_v16, %v1124_v13  ;;  %v1481_v9 = vpop.f32.mrf.mxu1  ;;  %v1147_v16 = vsel %vm842_vm2, %v1032_v34, 0.0 }
 0x13e   : > { %v1149_v60 = vsel %vm842_vm2, %v1033_v12, 0.0 }
 0x13f   : > { %v1128_v27 = vadd.f32 %v1127_v25, %v1126_v19  ;;  %v929_v28 = vadd.f32 %v928_v26, %v927_v18  ;;  %v950_v25 = vsel %vm842_vm2, %v1995_v47, 0.0  ;;  %v1035_v26 = vmul.f32 %v2019_v8, %v2019_v8 }
 0x140   : > { %v954_v47 = vsel %vm842_vm2, %v810_v44, 0.0 }
 0x141   : > { %v931_v31 = vadd.f32 %v930_v10, %v929_v28  ;;  %v1130_v32 = vadd.f32 %v1129_v58, %v1128_v27  ;;  %v826_v28 = vpop.f32.mrf.mxu1  ;;  %v1151_v58 = vsel %vm842_vm2, %v1034_v15, 0.0  ;;  %v952_v10 = vsel %vm842_vm2, %v2019_v8, 0.0 }
 0x143   : > { %v1132_v24 = vadd.f32 %v1131_v35, %v1130_v32  ;;  %v933_v37 = vadd.f32 %v932_v36, %v931_v31  ;;  %v1153_v32 = vsel %vm842_vm2, %v1035_v26, 0.0 }
 0x145   : > { %v935_v42 = vadd.f32 %v934_v6, %v933_v37  ;;  %v1134_v43 = vadd.f32 %v1133_v2, %v1132_v24  ;;  %v1482_v24 = vpop.f32.mrf.mxu1  ;;  %v1038_v37 = vmul.f32 %v2041_v33, %v2041_v33  ;;  %v1155_v6 = vsel %vm842_vm2, %v1036_v29, 0.0 }
 0x147   : > { %v1136_v48 = vadd.f32 %v1135_v46, %v1134_v43  ;;  %v937_v49 = vadd.f32 %v936_v17, %v935_v42  ;;  %v958_v42 = vsel %vm842_vm2, %v2041_v33, 0.0  ;;  %v1039_v43 = vmul.f32 %v1478_v56, %v1478_v56  ;;  %v829_v39 = vpop.f32.mrf.mxu1 }
 0x148   : > { %v1157_v46 = vsel %vm842_vm2, %v1037_v23, 0.0  ;;  %v1041_v57 = vmul.f32 %v829_v39, %v829_v39 }
 0x149   : > { %v939_v38 = vadd.f32 %v938_v50, %v937_v49  ;;  %v1138_v53 = vadd.f32 %v1137_v54, %v1136_v48  ;;  %v1159_v48 = vsel %vm842_vm2, %v1038_v37, 0.0  ;;  %v960_v49 = vsel %vm842_vm2, %v1478_v56, 0.0 }
 0x14a   : > { %v1040_v54 = vmul.f32 %v826_v28, %v826_v28  ;;  %v1043_v56 = vmul.f32 %v1482_v24, %v1482_v24 }
 0x14b   : > { %v1140_v61 = vadd.f32 %v1139_v21, %v1138_v53  ;;  %v941_v62 = vadd.f32 %v940_v59, %v939_v38  ;;  %v1161_v38 = vsel %vm842_vm2, %v1039_v43, 0.0  ;;  %v962_v53 = vsel %vm842_vm2, %v826_v28, 0.0 }
 0x14c   : > { %v1042_v59 = vmul.f32 %v1481_v9, %v1481_v9 }
 0x14d   : > { %v943_v0 = vadd.f32 %v942_v52, %v941_v62  ;;  %v1142_v30 = vadd.f32 %v1141_v63, %v1140_v61  ;;  %v1163_v61 = vsel %vm842_vm2, %v1040_v54, 0.0  ;;  %v964_v62 = vsel %vm842_vm2, %v829_v39, 0.0 }
 0x14e   : > { %v966_v63 = vsel %vm842_vm2, %v1481_v9, 0.0 }
 0x14f   : > { %v1144_v7 = vadd.f32 %v1143_v3, %v1142_v30  ;;  %v945_v45 = vadd.f32 %v944_v4, %v943_v0  ;;  %v1165_v0 = vsel %vm842_vm2, %v1041_v57, 0.0  ;;  %v1167_v3 = vsel %vm842_vm2, %v1042_v59, 0.0 }
 0x150   : > { %v968_v4 = vsel %vm842_vm2, %v1482_v24, 0.0 }
 0x151   : > { %v947_v13 = vadd.f32 %v946_v11, %v945_v45  ;;  %v1146_v14 = vadd.f32 %v1145_v55, %v1144_v7  ;;  %v1169_v45 = vsel %vm842_vm2, %v1043_v56, 0.0 }
 0x153   : > { %v1148_v18 = vadd.f32 %v1147_v16, %v1146_v14  ;;  %v949_v19 = vadd.f32 %v948_v20, %v947_v13 }
 0x155   : > { %v951_v40 = vadd.f32 %v950_v25, %v949_v19  ;;  %v1150_v27 = vadd.f32 %v1149_v60, %v1148_v18  ;;  %v841_v19 = vld [vmem:[%s1863_s11] sm:$0x1] }
 0x156   : > { %v979_v60 = vld [vmem:[%s1868_s18] sm:$0x1] }
 0x157   : > { %v1152_v22 = vadd.f32 %v1151_v58, %v1150_v27  ;;  %v953_v31 = vadd.f32 %v952_v10, %v951_v40 }
 0x159   : > { %v955_v35 = vadd.f32 %v954_v47, %v953_v31  ;;  %v1154_v36 = vadd.f32 %v1153_v32, %v1152_v22 }
 0x15b   : > { %v1156_v2 = vadd.f32 %v1155_v6, %v1154_v36  ;;  %v957_v8 = vadd.f32 %v956_v41, %v955_v35 }
 0x15d   : > { %v959_v44 = vadd.f32 %v958_v42, %v957_v8  ;;  %v1158_v17 = vadd.f32 %v1157_v46, %v1156_v2 }
 0x15f   : > { %v1160_v50 = vadd.f32 %v1159_v48, %v1158_v17  ;;  %v961_v51 = vadd.f32 %v960_v49, %v959_v44 }
 0x161   : > { %v963_v21 = vadd.f32 %v962_v53, %v961_v51  ;;  %v1162_v33 = vadd.f32 %v1161_v38, %v1160_v50 }
 0x163   : > { %v1164_v52 = vadd.f32 %v1163_v61, %v1162_v33  ;;  %v965_v5 = vadd.f32 %v964_v62, %v963_v21 }
 0x165   : > { %v967_v30 = vadd.f32 %v966_v63, %v965_v5  ;;  %v1166_v1 = vadd.f32 %v1165_v0, %v1164_v52 }
 0x167   : > { %v969_v34 = vadd.f32 %v968_v4, %v967_v30  ;;  %v1168_v7 = vadd.f32 %v1167_v3, %v1166_v1 }
 0x169   : > { %v970_v55 = vrot.slane %v969_v34, 4  ;;  %v1170_v11 = vadd.f32 %v1169_v45, %v1168_v7 }
 0x16b   : > { %v971_v12 = vadd.f32 %v970_v55, %v969_v34  ;;  %v1171_v13 = vrot.slane %v1170_v11, 4 }
 0x16d   : > { %v972_v14 = vrot.slane %v971_v12, 2  ;;  %v1172_v9 = vadd.f32 %v1171_v13, %v1170_v11 }
 0x16f   : > { %v973_v15 = vadd.f32 %v972_v14, %v971_v12  ;;  %v1173_v16 = vrot.slane %v1172_v9, 2 }
 0x171   : > { %v974_v20 = vrot.slane %v973_v15, 1  ;;  %v1174_v18 = vadd.f32 %v1173_v16, %v1172_v9 }
 0x173   : > { %v975_v25 = vadd.f32 %v974_v20, %v973_v15  ;;  %v1175_v26 = vrot.slane %v1174_v18, 1 }
 0x175   : > { %v976_v40 = vadd.f32 %v975_v25, %v841_v19  ;;  %v1176_v27 = vadd.f32 %v1175_v26, %v1174_v18 }
 0x177   : > { %978 = vst.msk [vmem:[%s1863_s11] sm:$0x1] %vm204_vm3, %v976_v40  ;;  %v1177_v28 = vadd.f32 %v1176_v27, %v979_v60 }
 0x178   : > { %1600 = shalt.err (!%p1597_p5)
}
 0x179   : > { %s1601_s9 = scalar_lea.hbm %s2121_s28, 16  ;;  %s1605_s26 = scalar_lea.hbm %s2202_s2, 32 }
 0x17a   : > { %p1602_p6 = scmp.ne.s32.totalorder %s2121_s28, %s1601_s9  ;;  %p1606_p10 = scmp.lt.s32.totalorder %s2121_s28, %s2202_s2 }
 0x17b   : > { %p1607_p11 = scmp.lt.s32.totalorder %s1605_s26, %s1601_s9 }
 0x17c   : > { %p1603_p7 = pnand %p1602_p6, %p1758_p4 }
 0x17d   : > { %p1608_p12 = por %p1607_p11, %p1606_p10 }
 0x17e   : > { %p1604_p9 = pneg %p1603_p7 }
 0x180   : > { %p1609_p13 = pnand %p1608_p12, %p1604_p9 }
 0x182   : > { %1612 = shalt.err (!%p1609_p13)
}
 0x183   : > { %1491 = dma.vmem_to_hbm [thread:$0]  (%p1758_p4), %s2123_s21, 16, %s2121_s28, %s1180_s4   ;;  %1178 = vst.msk [vmem:[%s1868_s18] sm:$0x1] %vm204_vm3, %v1177_v28 }
 0x184   : > { %s1184_s29 = scalar_lea.sflag [#allocation5], %s1856_s10  ;;  %s1613_s5 = scalar_lea.vmem %s2132_s23, 16 }
 0x185   : > { %p1614_p0 = scmp.ne.s32.totalorder %s2132_s23, %s1613_s5  ;;  %s1697_s6 = smov [#allocation4]  }
 0x186   : > { %s1617_s7 = sshll.u32 %s1697_s6, 4  ;;  %s1618_s7 = int_to_ptr.vmem [resolvable:$false] %s1617_s7 }
 0x187   : > { %p1615_p1 = pnand %p1614_p0, %p1758_p4  ;;  %s1619_s8 = scalar_lea.vmem %s1618_s7, 32 }
 0x188   : > { %p1620_p3 = scmp.lt.s32.totalorder %s2132_s23, %s1618_s7  ;;  %p1621_p5 = scmp.lt.s32.totalorder %s1619_s8, %s1613_s5 }
 0x189   : > { %p1616_p2 = pneg %p1615_p1 }
 0x18a   : > { %p1622_p6 = por %p1621_p5, %p1620_p3 }
 0x18c   : > { %p1623_p7 = pnand %p1622_p6, %p1616_p2 }
 0x18e   : > { %1626 = shalt.err (!%p1623_p7)
}
 0x18f   : > { %s1627_s18 = scalar_lea.hbm %s2130_s30, 16  ;;  %s1631_s28 = scalar_lea.hbm %s2203_s3, 32 }
 0x190   : > { %p1628_p9 = scmp.ne.s32.totalorder %s2130_s30, %s1627_s18  ;;  %p1632_p12 = scmp.lt.s32.totalorder %s2130_s30, %s2203_s3 }
 0x191   : > { %p1633_p13 = scmp.lt.s32.totalorder %s1631_s28, %s1627_s18 }
 0x192   : > { %p1629_p10 = pnand %p1628_p9, %p1758_p4 }
 0x193   : > { %p1634_p0 = por %p1633_p13, %p1632_p12 }
 0x194   : > { %p1630_p11 = pneg %p1629_p10 }
 0x196   : > { %p1635_p1 = pnand %p1634_p0, %p1630_p11 }
 0x198   : > { %1638 = shalt.err (!%p1635_p1)
}
 0x199   : > { %1492 = dma.vmem_to_hbm [thread:$0]  (%p1758_p4), %s2132_s23, 16, %s2130_s30, %s1184_s29  }
 0x19a PF: > { %p1502_p2 = scmp.ge.s32.totalorder %s1693_s17, 2  ;;  %s1221_s11 = sand.u32 1, %s1673_s12  }
 0x19b   : > { %s1222_s19 = scalar_lea.sflag [#allocation3], %s1221_s11 }
 0x19c   : > { %p1496_p3 = pnand %p1502_p2, %p1765_p8 }
 0x19e   : > { %p1497_p5 = pneg %p1496_p3 }
 0x1a0   : > { %1664 = dma.done.wait (%p1497_p5), %s1222_s19, 16  }
 0x1a1   : > { %1666 = vsyncadd (%p1497_p5), %s1222_s19, 4294967280  ;;  %s1230_s26 = scalar_lea.sflag [#allocation5], %s1221_s11 }
 0x1a2   : > { %1668 = dma.done.wait (%p1497_p5), %s1230_s26, 16  }
 0x1a3   : > { %1670 = vsyncadd (%p1497_p5), %s1230_s26, 4294967280  ;;  %s20_s17 = sadd.s32 1, %s1693_s17   ;;  %s2206_s12 = smov %s1677_s13 }
 0x1a4   : > { %p17_p6 = scmp.ge.s32.totalorder %s20_s17, 4   ;;  %s2207_s13 = smov %s1681_s14 }
 0x1a5   : > { %s2208_s14 = smov %s1771_s25  ;;  %s2209_s15 = smov %s1689_s16 }
 0x1a6   : > { %s2210_s16 = smov %s2212_s20  ;;  %19 = sbr.rel (!%p17_p6) target bundleno = 6 (0x6), region = 84 }
 0x1ab   :  { %1234 = vsyncpa [#allocation3], 1 }
 0x1ac   :  { %1236 = vsyncpa [#allocation3 + $0x1], 1 }
 0x1ad   :  { %1237 = vsyncpa [#allocation5], 1 }
 0x1ae   :  { %1239 = vsyncpa [#allocation5 + $0x1], 1 }

</bundles_post_ra>
